<compile_context>
chip_gen: v7x
topology: tpu7x:2x2x1
jax: 0.10.0
libtpu: 0.0.40
codegen_flags: <defaults>
</compile_context>

<pallas_src>
import jax
import jax.numpy as jnp
from jax.experimental import pallas as pl
from jax.experimental.pallas import tpu as pltpu

# ---- problem dimensions (state_dim dict of the PyTorch module) -------------
WAYPOINTS = 10            # state_dim['waypoints']
CONV_VEH = 3              # state_dim['conventional_vehicle']
VEH2 = CONV_VEH * 2       # 6
ONE = WAYPOINTS + VEH2    # 16  (one_state_dim)
EGO = 6                   # state_dim['ego_vehicle']
ACT_DIM = 2               # action_dim
STATE_DIM = 3 * ONE + EGO  # 54
IN_DIM = STATE_DIM + ACT_DIM  # 56
HID = 256


# ---- fused kernel -----------------------------------------------------------
def qvalue_kernel(x_ref, w1_ref, b1_ref, keep_ref,
                  w2_ref, b2_ref, fc_w_ref, fc_b_ref,
                  fco_w_ref, fco_b_ref, out_ref):
    x = x_ref[...].astype(jnp.bfloat16)   # (TB, 56) bf16 LHS for the MXU
    keep = keep_ref[...]                  # (1, 256) f32; 1.0 = bypass ReLU

    def masked_relu(h):
        # keep==0 -> max(h, 0) = relu ; keep==1 -> max(h, h) = identity
        return jnp.maximum(h, h * keep)

    # stage 1: all lane/veh/ego/action encoders as one bf16 matmul, f32 acc
    h1 = jnp.dot(x, w1_ref[...], preferred_element_type=jnp.float32) + b1_ref[...]
    h1 = masked_relu(h1)                  # (TB, 256) f32

    # stage 2: block-diagonal agg layers + ego/act identity passthrough
    h2 = jnp.dot(h1.astype(jnp.bfloat16), w2_ref[...],
                 preferred_element_type=jnp.float32) + b2_ref[...]
    h2 = masked_relu(h2)                  # (TB, 256) f32

    # fc + relu
    h3 = jnp.maximum(
        jnp.dot(h2.astype(jnp.bfloat16), fc_w_ref[...],
                preferred_element_type=jnp.float32) + fc_b_ref[...],
        0.0)                              # (TB, 256) f32

    # fc_out as VPU multiply + lane reduce (avoids an N=1 MXU pass)
    out_ref[...] = (jnp.sum(h3 * fco_w_ref[...], axis=-1, keepdims=True)
                    + fco_b_ref[...])     # (TB, 1) f32


# ---- wrapper ----------------------------------------------------------------
def pack_params(params):
    """Fold the 8 per-branch linears into block-structured W1/W2 (+ masks).

    Matmul weights are packed as bf16 (MXU-native); biases / masks / the
    fc_out row stay f32.
    """
    (l_lw, l_lb, l_vw, l_vb, l_aw, l_ab,
     c_lw, c_lb, c_vw, c_vb, c_aw, c_ab,
     r_lw, r_lb, r_vw, r_vb, r_aw, r_ab,
     ego_w, ego_b, act_w, act_b,
     fc_w, fc_b, fco_w, fco_b) = params

    w1 = jnp.zeros((IN_DIM, HID), jnp.float32)
    b1 = jnp.zeros((1, HID), jnp.float32)
    # (input_row_offset, input_rows, output_col_offset, W, b)
    blocks = [
        (0,                   WAYPOINTS, 0,   l_lw, l_lb),   # left lane  -> cols   0: 32
        (WAYPOINTS,           VEH2,      32,  l_vw, l_vb),   # left veh   -> cols  32: 64
        (ONE,                 WAYPOINTS, 64,  c_lw, c_lb),   # center lane-> cols  64: 96
        (ONE + WAYPOINTS,     VEH2,      96,  c_vw, c_vb),   # center veh -> cols  96:128
        (2 * ONE,             WAYPOINTS, 128, r_lw, r_lb),   # right lane -> cols 128:160
        (2 * ONE + WAYPOINTS, VEH2,      160, r_vw, r_vb),   # right veh  -> cols 160:192
        (3 * ONE,             EGO,       192, ego_w, ego_b),  # ego        -> cols 192:224
        (STATE_DIM,           ACT_DIM,   224, act_w, act_b),  # action     -> cols 224:256
    ]
    for r0, rn, c0, w, b in blocks:
        w1 = w1.at[r0:r0 + rn, c0:c0 + 32].set(w.astype(jnp.float32))
        b1 = b1.at[:, c0:c0 + 32].set(b.astype(jnp.float32))

    # ReLU applies to lane/veh/agg columns (0:192); ego/action (192:256) bypass it.
    keep = jnp.concatenate([jnp.zeros((1, 192), jnp.float32),
                            jnp.ones((1, 64), jnp.float32)], axis=1)

    w2 = jnp.zeros((HID, HID), jnp.float32)
    b2 = jnp.zeros((1, HID), jnp.float32)
    for off, aw, ab in ((0, l_aw, l_ab), (64, c_aw, c_ab), (128, r_aw, r_ab)):
        w2 = w2.at[off:off + 64, off:off + 64].set(aw.astype(jnp.float32))
        b2 = b2.at[:, off:off + 64].set(ab.astype(jnp.float32))
    w2 = w2.at[192:256, 192:256].set(jnp.eye(64, dtype=jnp.float32))  # ego/act passthrough

    fco_w_row = fco_w.astype(jnp.float32).reshape(1, HID)   # (256,1) -> (1,256)
    return (w1.astype(jnp.bfloat16), b1, keep,
            w2.astype(jnp.bfloat16), b2,
            fc_w.astype(jnp.bfloat16), fc_b.astype(jnp.float32),
            fco_w_row, fco_b.astype(jnp.float32))


def _round_up(n, m):
    return -(-n // m) * m


def qvalue_forward(state, action, packed, *, batch_tile=2048):
    B = state.shape[0]
    x = jnp.concatenate([state, action], axis=1).astype(jnp.float32)   # (B, 56)
    w1, b1, keep, w2, b2, fc_w, fc_b, fco_w_row, fco_b = packed

    # batch tile: multiple of 8 sublanes; capped at batch_tile.
    B8 = _round_up(B, 8)
    TB = max(8, (min(batch_tile, B8) // 8) * 8)
    # If the whole (non-trivial) batch fits in one tile, split it so the grid
    # has >=2 steps and both v7x TensorCores get work under "parallel".
    if TB == B8 and B8 >= 16:
        TB = _round_up(B8 // 2, 8)
    Bp = _round_up(B, TB)
    if Bp != B:
        x = jnp.pad(x, ((0, Bp - B), (0, 0)))
    grid = (Bp // TB,)

    def resident(arr):
        # full-array block, constant index_map -> stays in VMEM across the grid
        return pl.BlockSpec(arr.shape, lambda i: (0, 0))

    out = pl.pallas_call(
        qvalue_kernel,
        out_shape=jax.ShapeDtypeStruct((Bp, 1), jnp.float32),
        grid=grid,
        in_specs=[
            pl.BlockSpec((TB, IN_DIM), lambda i: (i, 0)),
            resident(w1), resident(b1), resident(keep),
            resident(w2), resident(b2),
            resident(fc_w), resident(fc_b),
            resident(fco_w_row), resident(fco_b),
        ],
        out_specs=pl.BlockSpec((TB, 1), lambda i: (i, 0)),
        compiler_params=pltpu.CompilerParams(
            dimension_semantics=("parallel",)),
    )(x, w1, b1, keep, w2, b2, fc_w, fc_b, fco_w_row, fco_b)
    return out[:B]


# ---- deterministic parameter init (PyTorch-default-style uniform) ----------
def init_linear(key, fan_in, fan_out):
    k_w, k_b = jax.random.split(key)
    bound = 1.0 / (fan_in ** 0.5)
    w = jax.random.uniform(k_w, (fan_in, fan_out), jnp.float32, -bound, bound)
    b = jax.random.uniform(k_b, (1, fan_out), jnp.float32, -bound, bound)
    return w, b


def make_params(key):
    keys = jax.random.split(key, 7)
    params = []
    # left / center / right veh_lane_encoder: lane(10->32), veh(6->32), agg(64->64)
    for i in range(3):
        k_lane, k_veh, k_agg = jax.random.split(keys[i], 3)
        params += list(init_linear(k_lane, WAYPOINTS, 32))
        params += list(init_linear(k_veh, VEH2, 32))
        params += list(init_linear(k_agg, 64, 64))
    params += list(init_linear(keys[3], EGO, 32))       # ego_encoder
    params += list(init_linear(keys[4], ACT_DIM, 32))   # action_encoder
    params += list(init_linear(keys[5], 256, 256))      # fc
    params += list(init_linear(keys[6], 256, 1))        # fc_out
    return params


# ---- pure-JAX reference (same math as the PyTorch module, f32) --------------
def ref_forward(state, action, params):
    (l_lw, l_lb, l_vw, l_vb, l_aw, l_ab,
     c_lw, c_lb, c_vw, c_vb, c_aw, c_ab,
     r_lw, r_lb, r_vw, r_vb, r_aw, r_ab,
     ego_w, ego_b, act_w, act_b,
     fc_w, fc_b, fco_w, fco_b) = params

    def enc(x, lw, lb, vw, vb, aw, ab):
        lane_e = jax.nn.relu(x[:, :WAYPOINTS] @ lw + lb)
        veh_e = jax.nn.relu(x[:, WAYPOINTS:] @ vw + vb)
        return jax.nn.relu(jnp.concatenate([lane_e, veh_e], axis=1) @ aw + ab)

    left = enc(state[:, :ONE], l_lw, l_lb, l_vw, l_vb, l_aw, l_ab)
    center = enc(state[:, ONE:2 * ONE], c_lw, c_lb, c_vw, c_vb, c_aw, c_ab)
    right = enc(state[:, 2 * ONE:3 * ONE], r_lw, r_lb, r_vw, r_vb, r_aw, r_ab)
    ego = state[:, 3 * ONE:] @ ego_w + ego_b
    act = action @ act_w + act_b
    cat = jnp.concatenate([left, center, right, ego, act], axis=1)
    hidden = jax.nn.relu(cat @ fc_w + fc_b)
    return hidden @ fco_w + fco_b


if __name__ == "__main__":
    key = jax.random.PRNGKey(0)
    k_state, k_action, k_params = jax.random.split(key, 3)
    params = make_params(k_params)
    packed = pack_params(params)

    # bf16 matmul operands vs f32 reference -> loosened tolerance (per review)
    ATOL = RTOL = 3e-2

    # 1) small inference-sized batch (single grid step, B padded 4 -> 8 rows)
    B = 4
    state = jax.random.normal(k_state, (B, STATE_DIM), jnp.float32)
    action = jax.random.normal(k_action, (B, ACT_DIM), jnp.float32)
    out = jax.block_until_ready(qvalue_forward(state, action, packed))
    expected = ref_forward(state, action, params)
    assert out.shape == (B, 1), out.shape
    assert jnp.allclose(out, expected, atol=ATOL, rtol=RTOL), (out, expected)

    # 2) explicit small batch_tile: exercises padding + a 3-step parallel grid
    B2 = 20
    state2 = jax.random.normal(jax.random.PRNGKey(1), (B2, STATE_DIM), jnp.float32)
    action2 = jax.random.normal(jax.random.PRNGKey(2), (B2, ACT_DIM), jnp.float32)
    out2 = jax.block_until_ready(
        qvalue_forward(state2, action2, packed, batch_tile=8))
    expected2 = ref_forward(state2, action2, params)
    assert out2.shape == (B2, 1), out2.shape
    assert jnp.allclose(out2, expected2, atol=ATOL, rtol=RTOL), (out2, expected2)

    # 3) default batch_tile path with automatic 2-way tile split (v7x megacore)
    B3 = 40
    state3 = jax.random.normal(jax.random.PRNGKey(3), (B3, STATE_DIM), jnp.float32)
    action3 = jax.random.normal(jax.random.PRNGKey(4), (B3, ACT_DIM), jnp.float32)
    out3 = jax.block_until_ready(qvalue_forward(state3, action3, packed))
    expected3 = ref_forward(state3, action3, params)
    assert out3.shape == (B3, 1), out3.shape
    assert jnp.allclose(out3, expected3, atol=ATOL, rtol=RTOL), (out3, expected3)

    print("KERNEL_OK")
</pallas_src>

<mosaic_0001>
module attributes {stable_mosaic.version = 11 : i64} {
  func.func @qvalue_kernel(%arg0: i32, %arg1: memref<8x56xf32, #tpu.memory_space<vmem>>, %arg2: memref<56x256xbf16, #tpu.memory_space<vmem>>, %arg3: memref<1x256xf32, #tpu.memory_space<vmem>>, %arg4: memref<1x256xf32, #tpu.memory_space<vmem>>, %arg5: memref<256x256xbf16, #tpu.memory_space<vmem>>, %arg6: memref<1x256xf32, #tpu.memory_space<vmem>>, %arg7: memref<256x256xbf16, #tpu.memory_space<vmem>>, %arg8: memref<1x256xf32, #tpu.memory_space<vmem>>, %arg9: memref<1x256xf32, #tpu.memory_space<vmem>>, %arg10: memref<1x1xf32, #tpu.memory_space<vmem>>, %arg11: memref<8x1xf32, #tpu.memory_space<vmem>>) attributes {dimension_semantics = [#tpu.dimension_semantics<parallel>], iteration_bounds = array<i64: 1>, scalar_prefetch = 0 : i64, scratch_operands = 0 : i64, tpu.core_type = #tpu.core_type<tc>, window_params = [{transform_indices = @transform_0, window_bounds = array<i64: 8, 56>}, {pipeline_mode = #tpu.pipeline_mode<synchronous>, transform_indices = @transform_1, window_bounds = array<i64: 56, 256>}, {pipeline_mode = #tpu.pipeline_mode<synchronous>, transform_indices = @transform_2, window_bounds = array<i64: 1, 256>}, {pipeline_mode = #tpu.pipeline_mode<synchronous>, transform_indices = @transform_3, window_bounds = array<i64: 1, 256>}, {pipeline_mode = #tpu.pipeline_mode<synchronous>, transform_indices = @transform_4, window_bounds = array<i64: 256, 256>}, {pipeline_mode = #tpu.pipeline_mode<synchronous>, transform_indices = @transform_5, window_bounds = array<i64: 1, 256>}, {pipeline_mode = #tpu.pipeline_mode<synchronous>, transform_indices = @transform_6, window_bounds = array<i64: 256, 256>}, {pipeline_mode = #tpu.pipeline_mode<synchronous>, transform_indices = @transform_7, window_bounds = array<i64: 1, 256>}, {pipeline_mode = #tpu.pipeline_mode<synchronous>, transform_indices = @transform_8, window_bounds = array<i64: 1, 256>}, {pipeline_mode = #tpu.pipeline_mode<synchronous>, transform_indices = @transform_9, window_bounds = array<i64: 1, 1>}, {transform_indices = @transform_10, window_bounds = array<i64: 8, 1>}]} {
    %c0 = arith.constant 0 : index
    %c0_0 = arith.constant 0 : index
    %0 = vector.load %arg1[%c0, %c0_0] : memref<8x56xf32, #tpu.memory_space<vmem>>, vector<8x56xf32>
    %1 = arith.truncf %0 : vector<8x56xf32> to vector<8x56xbf16>
    %c0_1 = arith.constant 0 : index
    %c0_2 = arith.constant 0 : index
    %2 = vector.load %arg4[%c0_1, %c0_2] : memref<1x256xf32, #tpu.memory_space<vmem>>, vector<1x256xf32>
    %c0_3 = arith.constant 0 : index
    %c0_4 = arith.constant 0 : index
    %3 = vector.load %arg2[%c0_3, %c0_4] : memref<56x256xbf16, #tpu.memory_space<vmem>>, vector<56x256xbf16>
    %cst = arith.constant dense<0.000000e+00> : vector<8x256xf32>
    %4 = tpu.matmul %1, %3, %cst {dimension_numbers = #tpu.dot_dimension_numbers<[1], [0], [0], [1], [0, 0, 1, 1], [], []>} : vector<8x56xbf16>, vector<56x256xbf16>, vector<8x256xf32> -> vector<8x256xf32>
    %c0_5 = arith.constant 0 : index
    %c0_6 = arith.constant 0 : index
    %5 = vector.load %arg3[%c0_5, %c0_6] : memref<1x256xf32, #tpu.memory_space<vmem>>, vector<1x256xf32>
    %6 = vector.broadcast %5 : vector<1x256xf32> to vector<8x256xf32>
    %7 = arith.addf %4, %6 : vector<8x256xf32>
    %8 = vector.broadcast %2 : vector<1x256xf32> to vector<8x256xf32>
    %9 = arith.mulf %7, %8 : vector<8x256xf32>
    %10 = arith.maximumf %7, %9 : vector<8x256xf32>
    %11 = arith.truncf %10 : vector<8x256xf32> to vector<8x256xbf16>
    %c0_7 = arith.constant 0 : index
    %c0_8 = arith.constant 0 : index
    %12 = vector.load %arg5[%c0_7, %c0_8] : memref<256x256xbf16, #tpu.memory_space<vmem>>, vector<256x256xbf16>
    %cst_9 = arith.constant dense<0.000000e+00> : vector<8x256xf32>
    %13 = tpu.matmul %11, %12, %cst_9 {dimension_numbers = #tpu.dot_dimension_numbers<[1], [0], [0], [1], [0, 0, 1, 1], [], []>} : vector<8x256xbf16>, vector<256x256xbf16>, vector<8x256xf32> -> vector<8x256xf32>
    %c0_10 = arith.constant 0 : index
    %c0_11 = arith.constant 0 : index
    %14 = vector.load %arg6[%c0_10, %c0_11] : memref<1x256xf32, #tpu.memory_space<vmem>>, vector<1x256xf32>
    %15 = vector.broadcast %14 : vector<1x256xf32> to vector<8x256xf32>
    %16 = arith.addf %13, %15 : vector<8x256xf32>
    %17 = vector.broadcast %2 : vector<1x256xf32> to vector<8x256xf32>
    %18 = arith.mulf %16, %17 : vector<8x256xf32>
    %19 = arith.maximumf %16, %18 : vector<8x256xf32>
    %20 = arith.truncf %19 : vector<8x256xf32> to vector<8x256xbf16>
    %c0_12 = arith.constant 0 : index
    %c0_13 = arith.constant 0 : index
    %21 = vector.load %arg7[%c0_12, %c0_13] : memref<256x256xbf16, #tpu.memory_space<vmem>>, vector<256x256xbf16>
    %cst_14 = arith.constant dense<0.000000e+00> : vector<8x256xf32>
    %22 = tpu.matmul %20, %21, %cst_14 {dimension_numbers = #tpu.dot_dimension_numbers<[1], [0], [0], [1], [0, 0, 1, 1], [], []>} : vector<8x256xbf16>, vector<256x256xbf16>, vector<8x256xf32> -> vector<8x256xf32>
    %c0_15 = arith.constant 0 : index
    %c0_16 = arith.constant 0 : index
    %23 = vector.load %arg8[%c0_15, %c0_16] : memref<1x256xf32, #tpu.memory_space<vmem>>, vector<1x256xf32>
    %24 = vector.broadcast %23 : vector<1x256xf32> to vector<8x256xf32>
    %25 = arith.addf %22, %24 : vector<8x256xf32>
    %cst_17 = arith.constant 0.000000e+00 : f32
    %26 = vector.broadcast %cst_17 : f32 to vector<8x256xf32>
    %27 = arith.maximumf %25, %26 : vector<8x256xf32>
    %c0_18 = arith.constant 0 : index
    %c0_19 = arith.constant 0 : index
    %28 = vector.load %arg9[%c0_18, %c0_19] : memref<1x256xf32, #tpu.memory_space<vmem>>, vector<1x256xf32>
    %29 = vector.broadcast %28 : vector<1x256xf32> to vector<8x256xf32>
    %30 = arith.mulf %27, %29 : vector<8x256xf32>
    %cst_20 = arith.constant dense<0.000000e+00> : vector<8xf32>
    %31 = vector.multi_reduction <add>, %30, %cst_20 [1] : vector<8x256xf32> to vector<8xf32>
    %32 = vector.shape_cast %31 : vector<8xf32> to vector<8x1xf32>
    %c0_21 = arith.constant 0 : index
    %c0_22 = arith.constant 0 : index
    %33 = vector.load %arg10[%c0_21, %c0_22] : memref<1x1xf32, #tpu.memory_space<vmem>>, vector<1x1xf32>
    %34 = vector.broadcast %33 : vector<1x1xf32> to vector<8x1xf32>
    %35 = arith.addf %32, %34 : vector<8x1xf32>
    %c0_23 = arith.constant 0 : index
    %c0_24 = arith.constant 0 : index
    %36 = vector.load %arg11[%c0_23, %c0_24] : memref<8x1xf32, #tpu.memory_space<vmem>>, vector<8x1xf32>
    tpu.vector_store %arg11[%c0_23, %c0_24], %35 {strides = array<i32>} : memref<8x1xf32, #tpu.memory_space<vmem>>, vector<8x1xf32>,
    return
  }
  func.func @transform_0(%arg0: i32) -> (i32, i32) {
    %c0_i32 = arith.constant 0 : i32
    %c0_i32_0 = arith.constant 0 : i32
    return %arg0, %c0_i32 : i32, i32
  }
  func.func @transform_1(%arg0: i32) -> (i32, i32) {
    %c0_i32 = arith.constant 0 : i32
    %c0_i32_0 = arith.constant 0 : i32
    %c0_i32_1 = arith.constant 0 : i32
    return %c0_i32, %c0_i32_0 : i32, i32
  }
  func.func @transform_2(%arg0: i32) -> (i32, i32) {
    %c0_i32 = arith.constant 0 : i32
    %c0_i32_0 = arith.constant 0 : i32
    %c0_i32_1 = arith.constant 0 : i32
    return %c0_i32, %c0_i32_0 : i32, i32
  }
  func.func @transform_3(%arg0: i32) -> (i32, i32) {
    %c0_i32 = arith.constant 0 : i32
    %c0_i32_0 = arith.constant 0 : i32
    %c0_i32_1 = arith.constant 0 : i32
    return %c0_i32, %c0_i32_0 : i32, i32
  }
  func.func @transform_4(%arg0: i32) -> (i32, i32) {
    %c0_i32 = arith.constant 0 : i32
    %c0_i32_0 = arith.constant 0 : i32
    %c0_i32_1 = arith.constant 0 : i32
    return %c0_i32, %c0_i32_0 : i32, i32
  }
  func.func @transform_5(%arg0: i32) -> (i32, i32) {
    %c0_i32 = arith.constant 0 : i32
    %c0_i32_0 = arith.constant 0 : i32
    %c0_i32_1 = arith.constant 0 : i32
    return %c0_i32, %c0_i32_0 : i32, i32
  }
  func.func @transform_6(%arg0: i32) -> (i32, i32) {
    %c0_i32 = arith.constant 0 : i32
    %c0_i32_0 = arith.constant 0 : i32
    %c0_i32_1 = arith.constant 0 : i32
    return %c0_i32, %c0_i32_0 : i32, i32
  }
  func.func @transform_7(%arg0: i32) -> (i32, i32) {
    %c0_i32 = arith.constant 0 : i32
    %c0_i32_0 = arith.constant 0 : i32
    %c0_i32_1 = arith.constant 0 : i32
    return %c0_i32, %c0_i32_0 : i32, i32
  }
  func.func @transform_8(%arg0: i32) -> (i32, i32) {
    %c0_i32 = arith.constant 0 : i32
    %c0_i32_0 = arith.constant 0 : i32
    %c0_i32_1 = arith.constant 0 : i32
    return %c0_i32, %c0_i32_0 : i32, i32
  }
  func.func @transform_9(%arg0: i32) -> (i32, i32) {
    %c0_i32 = arith.constant 0 : i32
    %c0_i32_0 = arith.constant 0 : i32
    %c0_i32_1 = arith.constant 0 : i32
    return %c0_i32, %c0_i32_0 : i32, i32
  }
  func.func @transform_10(%arg0: i32) -> (i32, i32) {
    %c0_i32 = arith.constant 0 : i32
    %c0_i32_0 = arith.constant 0 : i32
    return %arg0, %c0_i32 : i32, i32
  }
}

</mosaic_0001>

<bundles_post_ra>
// kernel: tpu_custom_call.1
= control target key start
LH: loop header
LB: loop body
LE: loop exit
PB: predicated region body
PF: predicated region fallthrough
CT: control target
= control target key end

     0   :  { %s1172_s0 = inlined_call_operand.hbm [shape: f32[8,56], index: 0, kind: input, shape index: {}]   ;;  %s1173_s1 = inlined_call_operand.hbm [shape: bf16[56,256], index: 1, kind: input, shape index: {}]   ;;  %s1174_s2 = inlined_call_operand.vmem [shape: f32[1,256], index: 2, kind: input, shape index: {}]   ;;  %s1175_s3 = inlined_call_operand.vmem [shape: f32[1,256], index: 3, kind: input, shape index: {}]   ;;  %s1176_s4 = inlined_call_operand.hbm [shape: bf16[256,256], index: 4, kind: input, shape index: {}]   ;;  %s1177_s5 = inlined_call_operand.vmem [shape: f32[1,256], index: 5, kind: input, shape index: {}]   ;;  %s1178_s6 = inlined_call_operand.hbm [shape: bf16[256,256], index: 6, kind: input, shape index: {}]   ;;  %s1179_s7 = inlined_call_operand.vmem [shape: f32[1,256], index: 7, kind: input, shape index: {}]   ;;  %s1180_s8 = inlined_call_operand.vmem [shape: f32[1,256], index: 8, kind: input, shape index: {}]   ;;  %s1181_s9 = inlined_call_operand.<no memory space> [shape: f32[1,1], index: 9, kind: input, shape index: {}]   ;;  %s1182_s10 = inlined_call_operand.vmem [shape: f32[8,1], index: 10, kind: output, shape index: {}]  }
   0x1   :  { %v15_v0 = vstv %s1181_s9 }
   0x2   :  { %16 = vst [vmem:[#allocation2] sm:$0x1] %v15_v0 }
   0x3   :  { %17 = vsyncpa [#allocation4], 0 }
   0x4   :  { %18 = vsyncpa [#allocation6], 0 }
   0x5   :  { %19 = vsyncpa [#allocation9], 0  ;;  %s1032_s15 = smov [#allocation5]   ;;  %s938_s19 = scalar_lea.hbm %s1173_s1, 896 }
   0x6   :  { %s35_s16 = sshll.u32 %s1032_s15, 4  ;;  %p939_p0 = scmp.ne.s32.totalorder %s1173_s1, %s938_s19  ;;  %s36_s16 = int_to_ptr.vmem [resolvable:$true] %s35_s16 }
   0x7   :  { %p942_p1 = scmp.lt.u32.totalorder %s938_s19, %s1173_s1 }
   0x9   :  { %p944_p2 = pnand %p942_p1, %p939_p0 }
   0xb   :  { %947 = shalt.err (!%p944_p2)
}
   0xc   :  { %s948_s9 = scalar_lea.vmem %s36_s16, 896  ;;  %p953_p4 = scmp.lt.s32.totalorder %s36_s16, %s36_s16 }
   0xd   :  { %p949_p3 = scmp.ne.s32.totalorder %s36_s16, %s948_s9  ;;  %p954_p5 = scmp.lt.s32.totalorder %s948_s9, %s948_s9 }
   0xf   :  { %p955_p6 = por %p954_p5, %p953_p4 }
  0x11   :  { %p956_p7 = pnand %p955_p6, %p949_p3 }
  0x13   :  { %959 = shalt.err (!%p956_p7)
}
  0x14   :  { %s1033_s24 = smov 128   ;;  %s1034_s25 = smov 8  }
  0x15   :  { %41 = dma.hbm_to_vmem [thread:$0]  %s1173_s1, 896, %s36_s16, [#allocation6], %s1033_s24, %s1033_s24, %s1034_s25  }
  0x16   :  { %s1035_s28 = smov [#allocation3]   ;;  %s1036_s30 = smov [#allocation7]  }
  0x17   :  { %s26_s29 = sshll.u32 %s1035_s28, 4  ;;  %s51_s11 = sshll.u32 %s1036_s30, 4  ;;  %s27_s29 = int_to_ptr.vmem [resolvable:$true] %s26_s29  ;;  %s52_s11 = int_to_ptr.vmem [resolvable:$true] %s51_s11 }
  0x18   :  { %s960_s14 = scalar_lea.hbm %s1172_s0, 128 }
  0x19   :  { %p961_p8 = scmp.ne.s32.totalorder %s1172_s0, %s960_s14  ;;  %p964_p9 = scmp.lt.u32.totalorder %s960_s14, %s1172_s0 }
  0x1b   :  { %p966_p10 = pnand %p964_p9, %p961_p8 }
  0x1d   :  { %969 = shalt.err (!%p966_p10)
}
  0x1e   :  { %s970_s1 = scalar_lea.vmem %s27_s29, 128  ;;  %p975_p12 = scmp.lt.s32.totalorder %s27_s29, %s27_s29 }
  0x1f   :  { %p971_p11 = scmp.ne.s32.totalorder %s27_s29, %s970_s1  ;;  %p976_p13 = scmp.lt.s32.totalorder %s970_s1, %s970_s1 }
  0x21   :  { %p977_p0 = por %p976_p13, %p975_p12 }
  0x23   :  { %p978_p1 = pnand %p977_p0, %p971_p11 }
  0x25   :  { %981 = shalt.err (!%p978_p1)
}
  0x26   :  { %29 = dma.hbm_to_vmem [thread:$0]  %s1172_s0, 128, %s27_s29, [#allocation4]  }
  0x27   :  { %s982_s23 = scalar_lea.hbm %s1176_s4, 4096 }
  0x28   :  { %p983_p2 = scmp.ne.s32.totalorder %s1176_s4, %s982_s23  ;;  %p986_p3 = scmp.lt.u32.totalorder %s982_s23, %s1176_s4 }
  0x2a   :  { %p988_p4 = pnand %p986_p3, %p983_p2 }
  0x2c   :  { %991 = shalt.err (!%p988_p4)
}
  0x2d   :  { %s992_s30 = scalar_lea.vmem %s52_s11, 4096  ;;  %p997_p6 = scmp.lt.s32.totalorder %s52_s11, %s52_s11 }
  0x2e   :  { %p993_p5 = scmp.ne.s32.totalorder %s52_s11, %s992_s30  ;;  %p998_p7 = scmp.lt.s32.totalorder %s992_s30, %s992_s30 }
  0x30   :  { %p999_p8 = por %p998_p7, %p997_p6 }
  0x32   :  { %p1000_p9 = pnand %p999_p8, %p993_p5 }
  0x34   :  { %1003 = shalt.err (!%p1000_p9)
}
  0x35   :  { %57 = dma.hbm_to_vmem [thread:$0]  %s1176_s4, 4096, %s52_s11, [#allocation6], %s1033_s24, %s1033_s24, %s1034_s25  }
  0x36   :  { %s1037_s12 = smov [#allocation8]   ;;  %s1004_s17 = scalar_lea.hbm %s1178_s6, 4096 }
  0x37   :  { %s65_s13 = sshll.u32 %s1037_s12, 4  ;;  %p1005_p10 = scmp.ne.s32.totalorder %s1178_s6, %s1004_s17  ;;  %s66_s13 = int_to_ptr.vmem [resolvable:$true] %s65_s13 }
  0x38   :  { %p1008_p11 = scmp.lt.u32.totalorder %s1004_s17, %s1178_s6 }
  0x3a   :  { %p1010_p12 = pnand %p1008_p11, %p1005_p10 }
  0x3c   :  { %1013 = shalt.err (!%p1010_p12)
}
  0x3d   :  { %s1014_s20 = scalar_lea.vmem %s66_s13, 4096  ;;  %p1019_p0 = scmp.lt.s32.totalorder %s66_s13, %s66_s13 }
  0x3e   :  { %p1015_p13 = scmp.ne.s32.totalorder %s66_s13, %s1014_s20  ;;  %p1020_p1 = scmp.lt.s32.totalorder %s1014_s20, %s1014_s20 }
  0x40   :  { %p1021_p2 = por %p1020_p1, %p1019_p0 }
  0x42   :  { %p1022_p3 = pnand %p1021_p2, %p1015_p13 }
  0x44   :  { %1025 = shalt.err (!%p1022_p3)
}
  0x45   :  { %71 = dma.hbm_to_vmem [thread:$0]  %s1178_s6, 4096, %s66_s13, [#allocation9], %s1033_s24, %s1033_s24, %s1034_s25  }
  0x46   :  { %1026 = dma.done.wait [#allocation4], 128  }
  0x47   :  { %1027 = vsyncadd [#allocation4], 4294967168 }
  0x48   :  { %1028 = dma.done.wait [#allocation6], 4992  }
  0x49   :  { %1029 = vsyncadd [#allocation6], 4294962304 }
  0x4a   :  { %1030 = dma.done.wait [#allocation9], 4096  }
  0x4b   :  { %1031 = vsyncadd [#allocation9], 4294963200  ;;  %v1038_v1 = vmov 0   ;;  %v831_v2 = vld [vmem:[#allocation5 + $0x4] ss:$8 sps:$4 sm:$0xff]   ;;  %v100_v7 = vld [vmem:[#allocation5 + $0x30] sm:$0xff] }
  0x4c   :  { %191 = vmatprep.mubr.bf16.mxu0 %v1038_v1  ;;  %v833_v3 = vld [vmem:[#allocation5] ss:$8 sps:$4 sm:$0xff]   ;;  %159 = vmatprep.subr.bf16.mxu0 %v831_v2  ;;  %v834_v4 = vld [vmem:[#allocation5 + $0x14] ss:$8 sps:$4 sm:$0xff]   ;;  %v836_v5 = vld [vmem:[#allocation5 + $0x10] ss:$8 sps:$4 sm:$0xff]   ;;  %v756_v12 = vcombine.high %v100_v7, %v100_v7  ;;  %v755_v13 = vcombine.low %v100_v7, %v100_v7 }
  0x4d   :  { %160 = vmatpush1.bf16.msra.mxu0 %v833_v3  ;;  %v837_v6 = vld [vmem:[#allocation5 + $0x24] ss:$8 sps:$4 sm:$0xff]   ;;  %v844_v9 = vld [vmem:[#allocation7] ss:$8 sps:$4 sm:$0xff]   ;;  %v847_v14 = vld [vmem:[#allocation7 + $0x10] ss:$8 sps:$4 sm:$0xff]  }
  0x4e   :  { %161 = vmatprep.subr.bf16.mxu0 %v834_v4  ;;  %v842_v8 = vld [vmem:[#allocation7 + $0x4] ss:$8 sps:$4 sm:$0xff]   ;;  %v845_v10 = vld [vmem:[#allocation7 + $0x14] ss:$8 sps:$4 sm:$0xff]   ;;  %v839_v11 = vld [vmem:[#allocation5 + $0x20] ss:$8 sps:$4 sm:$0xff]  }
  0x4f   :  { %421 = vmatprep.subr.bf16.mxu1 %v842_v8  ;;  %vm152_vm0 = vcmask 1043456   ;;  %v848_v15 = vld [vmem:[#allocation7 + $0x24] ss:$8 sps:$4 sm:$0xff]   ;;  %v850_v18 = vld [vmem:[#allocation7 + $0x20] ss:$8 sps:$4 sm:$0xff]   ;;  %vm148_vm1 = vcmask 457728  }
  0x50   :  { %422 = vmatpush1.bf16.msra.mxu1 %v844_v9  ;;  %v91_v16 = vld [vmem:[#allocation3] sm:$0xff]  ;;  %v154_v17 = vsel %vm152_vm0, %v755_v13, 0  ;;  %v851_v19 = vld [vmem:[#allocation7 + $0x34] ss:$8 sps:$4 sm:$0xff]   ;;  %v853_v21 = vld [vmem:[#allocation7 + $0x30] ss:$8 sps:$4 sm:$0xff]  }
  0x51   :  { %162 = vmatpush1.bf16.msra.mxu0 %v836_v5  ;;  %423 = vmatprep.subr.bf16.mxu1 %v845_v10  ;;  %v92_v20 = vpack.c.bf16 %v91_v16, %v91_v16  ;;  %v854_v22 = vld [vmem:[#allocation7 + $0x44] ss:$8 sps:$4 sm:$0xff]   ;;  %v856_v23 = vld [vmem:[#allocation7 + $0x40] ss:$8 sps:$4 sm:$0xff]   ;;  %v857_v24 = vld [vmem:[#allocation7 + $0x54] ss:$8 sps:$4 sm:$0xff]   ;;  %v103_v10 = vlaneseq }
  0x52   :  { %163 = vmatprep.subr.bf16.mxu0 %v837_v6  ;;  %v859_v25 = vld [vmem:[#allocation7 + $0x50] ss:$8 sps:$4 sm:$0xff]   ;;  %v860_v26 = vld [vmem:[#allocation7 + $0x64] ss:$8 sps:$4 sm:$0xff]   ;;  %v862_v27 = vld [vmem:[#allocation7 + $0x60] ss:$8 sps:$4 sm:$0xff]  }
  0x53   :  { %v863_v28 = vld [vmem:[#allocation7 + $0x74] ss:$8 sps:$4 sm:$0xff]   ;;  %v865_v29 = vld [vmem:[#allocation7 + $0x70] ss:$8 sps:$4 sm:$0xff]   ;;  %v866_v30 = vld [vmem:[#allocation7 + $0x84] ss:$8 sps:$4 sm:$0xff]  }
  0x54   :  { %424 = vmatpush1.bf16.msra.mxu1 %v847_v14  ;;  %v868_v31 = vld [vmem:[#allocation7 + $0x80] ss:$8 sps:$4 sm:$0xff]   ;;  %v869_v32 = vld [vmem:[#allocation7 + $0x94] ss:$8 sps:$4 sm:$0xff]   ;;  %v871_v33 = vld [vmem:[#allocation7 + $0x90] ss:$8 sps:$4 sm:$0xff]  }
  0x55   :  { %164 = vmatpush1.bf16.msra.mxu0 %v839_v11  ;;  %425 = vmatprep.subr.bf16.mxu1 %v848_v15  ;;  %v872_v34 = vld [vmem:[#allocation7 + $0xa4] ss:$8 sps:$4 sm:$0xff]   ;;  %v874_v35 = vld [vmem:[#allocation7 + $0xa0] ss:$8 sps:$4 sm:$0xff]   ;;  %v875_v36 = vld [vmem:[#allocation7 + $0xb4] ss:$8 sps:$4 sm:$0xff]  }
  0x56   :  { %757 = vmatprep.subr.msk.bf16.mxu0 %vm152_vm0, %v756_v12  ;;  %v877_v37 = vld [vmem:[#allocation7 + $0xb0] ss:$8 sps:$4 sm:$0xff]   ;;  %v878_v38 = vld [vmem:[#allocation7 + $0xc4] ss:$8 sps:$4 sm:$0xff]   ;;  %v880_v39 = vld [vmem:[#allocation7 + $0xc0] ss:$8 sps:$4 sm:$0xff]  }
  0x57   :  { %v881_v40 = vld [vmem:[#allocation7 + $0xd4] ss:$8 sps:$4 sm:$0xff]   ;;  %v883_v41 = vld [vmem:[#allocation7 + $0xd0] ss:$8 sps:$4 sm:$0xff]   ;;  %v884_v42 = vld [vmem:[#allocation7 + $0xe4] ss:$8 sps:$4 sm:$0xff]  }
  0x58   :  { %426 = vmatpush1.bf16.msra.mxu1 %v850_v18  ;;  %v886_v43 = vld [vmem:[#allocation7 + $0xe0] ss:$8 sps:$4 sm:$0xff]   ;;  %v887_v44 = vld [vmem:[#allocation7 + $0xf4] ss:$8 sps:$4 sm:$0xff]   ;;  %v889_v45 = vld [vmem:[#allocation7 + $0xf0] ss:$8 sps:$4 sm:$0xff]  }
  0x59   :  { %166 = vmatpush1.bf16.msra.mxu0 %v154_v17  ;;  %427 = vmatprep.subr.bf16.mxu1 %v851_v19  ;;  %v890_v46 = vld [vmem:[#allocation8] ss:$8 sps:$4 sm:$0xff]   ;;  %v892_v47 = vld [vmem:[#allocation8 + $0x4] ss:$8 sps:$4 sm:$0xff]   ;;  %v895_v48 = vld [vmem:[#allocation8 + $0x14] ss:$8 sps:$4 sm:$0xff]  }
  0x5a   :  { %672 = vmatprep.subr.bf16.mxu0 %v892_v47  ;;  %v893_v49 = vld [vmem:[#allocation8 + $0x10] ss:$8 sps:$4 sm:$0xff]   ;;  %v898_v50 = vld [vmem:[#allocation8 + $0x24] ss:$8 sps:$4 sm:$0xff]   ;;  %v896_v51 = vld [vmem:[#allocation8 + $0x20] ss:$8 sps:$4 sm:$0xff]  }
  0x5b   :  { %v901_v52 = vld [vmem:[#allocation8 + $0x34] ss:$8 sps:$4 sm:$0xff]   ;;  %v899_v53 = vld [vmem:[#allocation8 + $0x30] ss:$8 sps:$4 sm:$0xff]   ;;  %v904_v54 = vld [vmem:[#allocation8 + $0x44] ss:$8 sps:$4 sm:$0xff]  }
  0x5c   :  { %758 = vmatmul.mubr.msk.bf16.vlgmr.msra.gmra.mrb[0].mxu0 %vm148_vm1, %v92_v20  ;;  %428 = vmatpush1.bf16.msra.mxu1 %v853_v21  ;;  %v902_v55 = vld [vmem:[#allocation8 + $0x40] ss:$8 sps:$4 sm:$0xff]   ;;  %v907_v56 = vld [vmem:[#allocation8 + $0x54] ss:$8 sps:$4 sm:$0xff]   ;;  %v905_v57 = vld [vmem:[#allocation8 + $0x50] ss:$8 sps:$4 sm:$0xff]  }
  0x5d   :  { %429 = vmatprep.subr.bf16.mxu1 %v854_v22  ;;  %673 = vmatpush1.bf16.msra.mxu0 %v890_v46  ;;  %v910_v58 = vld [vmem:[#allocation8 + $0x64] ss:$8 sps:$4 sm:$0xff]   ;;  %v908_v59 = vld [vmem:[#allocation8 + $0x60] ss:$8 sps:$4 sm:$0xff]   ;;  %v913_v60 = vld [vmem:[#allocation8 + $0x74] ss:$8 sps:$4 sm:$0xff]  }
  0x5e   :  { %674 = vmatprep.subr.bf16.mxu0 %v895_v48  ;;  %v911_v61 = vld [vmem:[#allocation8 + $0x70] ss:$8 sps:$4 sm:$0xff]   ;;  %v916_v62 = vld [vmem:[#allocation8 + $0x84] ss:$8 sps:$4 sm:$0xff]   ;;  %v914_v63 = vld [vmem:[#allocation8 + $0x80] ss:$8 sps:$4 sm:$0xff]  }
  0x5f   :  { %v919_v0 = vld [vmem:[#allocation8 + $0x94] ss:$8 sps:$4 sm:$0xff]   ;;  %v917_v1 = vld [vmem:[#allocation8 + $0x90] ss:$8 sps:$4 sm:$0xff]   ;;  %v922_v2 = vld [vmem:[#allocation8 + $0xa4] ss:$8 sps:$4 sm:$0xff]  }
  0x60   :  { %430 = vmatpush1.bf16.msra.mxu1 %v856_v23  ;;  %v920_v3 = vld [vmem:[#allocation8 + $0xa0] ss:$8 sps:$4 sm:$0xff]   ;;  %v925_v4 = vld [vmem:[#allocation8 + $0xb4] ss:$8 sps:$4 sm:$0xff]   ;;  %v923_v5 = vld [vmem:[#allocation8 + $0xb0] ss:$8 sps:$4 sm:$0xff]  }
  0x61   :  { %431 = vmatprep.subr.bf16.mxu1 %v857_v24  ;;  %675 = vmatpush1.bf16.msra.mxu0 %v893_v49  ;;  %v928_v6 = vld [vmem:[#allocation8 + $0xc4] ss:$8 sps:$4 sm:$0xff]   ;;  %v926_v7 = vld [vmem:[#allocation8 + $0xc0] ss:$8 sps:$4 sm:$0xff]   ;;  %v931_v8 = vld [vmem:[#allocation8 + $0xd4] ss:$8 sps:$4 sm:$0xff]  }
  0x62   :  { %676 = vmatprep.subr.bf16.mxu0 %v898_v50  ;;  %v929_v9 = vld [vmem:[#allocation8 + $0xd0] ss:$8 sps:$4 sm:$0xff]   ;;  %v104_v11 = vshrl.u32 %v103_v10, 7  ;;  %v101_v13 = vld [vmem:[%s1174_s2] sm:$0x3]  ;;  %vm740_vm2 = vcmask 7168  }
  0x63   :  { %v93_v15 = vld [vmem:[%s1175_s3] sm:$0x3] }
  0x64   :  { %432 = vmatpush1.bf16.msra.mxu1 %v859_v25  ;;  %v105_v12 = vsub.s32 0, %v104_v11  ;;  %v109_v14 = vsub.s32 1, %v104_v11 }
  0x65   :  { %433 = vmatprep.subr.bf16.mxu1 %v860_v26  ;;  %677 = vmatpush1.bf16.msra.mxu0 %v896_v51  ;;  %v500_v51 = vld [vmem:[%s1179_s7] sm:$0x3] }
  0x66   :  { %678 = vmatprep.subr.bf16.mxu0 %v901_v52  ;;  %v106_v16 = vrot.slane %v101_v13, %v105_v12  ;;  %v110_v17 = vrot.slane %v101_v13, %v109_v14  ;;  %v204_v18 = vrot.slane %v93_v15, %v105_v12  ;;  %v208_v20 = vrot.slane %v93_v15, %v109_v14 }
  0x67   :  { %v505_v52 = vrot.slane %v500_v51, %v105_v12 }
  0x68   :  { %434 = vmatpush1.bf16.msra.mxu1 %v862_v27 }
  0x69   :  { %435 = vmatprep.subr.bf16.mxu1 %v863_v28  ;;  %679 = vmatpush1.bf16.msra.mxu0 %v899_v53  ;;  %v509_v53 = vrot.slane %v500_v51, %v109_v14 }
  0x6a   :  { %680 = vmatprep.subr.bf16.mxu0 %v904_v54  ;;  %v715_v54 = vld [vmem:[%s1180_s8] sm:$0x3] }
  0x6c   :  { %436 = vmatpush1.bf16.msra.mxu1 %v865_v29 }
  0x6d   :  { %437 = vmatprep.subr.bf16.mxu1 %v866_v30  ;;  %681 = vmatpush1.bf16.msra.mxu0 %v902_v55 }
  0x6e   :  { %682 = vmatprep.subr.bf16.mxu0 %v907_v56 }
  0x70   :  { %438 = vmatpush1.bf16.msra.mxu1 %v868_v31 }
  0x71   :  { %439 = vmatprep.subr.bf16.mxu1 %v869_v32  ;;  %683 = vmatpush1.bf16.msra.mxu0 %v905_v57  ;;  %v934_v32 = vld [vmem:[#allocation8 + $0xe4] ss:$8 sps:$4 sm:$0xff]  }
  0x72   :  { %684 = vmatprep.subr.bf16.mxu0 %v910_v58  ;;  %v720_v58 = vrot.slane %v715_v54, %v105_v12 }
  0x74   :  { %440 = vmatpush1.bf16.msra.mxu1 %v871_v33  ;;  %v932_v33 = vld [vmem:[#allocation8 + $0xe0] ss:$8 sps:$4 sm:$0xff]  }
  0x75   :  { %441 = vmatprep.subr.bf16.mxu1 %v872_v34  ;;  %685 = vmatpush1.bf16.msra.mxu0 %v908_v59  ;;  %v937_v34 = vld [vmem:[#allocation8 + $0xf4] ss:$8 sps:$4 sm:$0xff]  }
  0x76   :  { %686 = vmatprep.subr.bf16.mxu0 %v913_v60 }
  0x78   :  { %442 = vmatpush1.bf16.msra.mxu1 %v874_v35  ;;  %v935_v35 = vld [vmem:[#allocation8 + $0xf0] ss:$8 sps:$4 sm:$0xff]  }
  0x79   :  { %443 = vmatprep.subr.bf16.mxu1 %v875_v36  ;;  %687 = vmatpush1.bf16.msra.mxu0 %v911_v61  ;;  %v249_v36 = vld [vmem:[%s1177_s5] sm:$0x3]  ;;  %v724_v61 = vrot.slane %v715_v54, %v109_v14 }
  0x7a   :  { %688 = vmatprep.subr.bf16.mxu0 %v916_v62 }
  0x7c   :  { %444 = vmatpush1.bf16.msra.mxu1 %v877_v37  ;;  %v254_v37 = vrot.slane %v249_v36, %v105_v12 }
  0x7d   :  { %445 = vmatprep.subr.bf16.mxu1 %v878_v38  ;;  %689 = vmatpush1.bf16.msra.mxu0 %v914_v63  ;;  %v258_v38 = vrot.slane %v249_v36, %v109_v14 }
  0x7e   :  { %690 = vmatprep.subr.bf16.mxu0 %v919_v0 }
  0x80   :  { %446 = vmatpush1.bf16.msra.mxu1 %v880_v39 }
  0x81   :  { %447 = vmatprep.subr.bf16.mxu1 %v881_v40  ;;  %691 = vmatpush1.bf16.msra.mxu0 %v917_v1 }
  0x82   :  { %692 = vmatprep.subr.bf16.mxu0 %v922_v2 }
  0x84   :  { %448 = vmatpush1.bf16.msra.mxu1 %v883_v41 }
  0x85   :  { %449 = vmatprep.subr.bf16.mxu1 %v884_v42  ;;  %693 = vmatpush1.bf16.msra.mxu0 %v920_v3 }
  0x86   :  { %694 = vmatprep.subr.bf16.mxu0 %v925_v4  ;;  %v823_v4 = vld [vmem:[#allocation2] ss:$0 sm:$0xff] }
  0x88   :  { %450 = vmatpush1.bf16.msra.mxu1 %v886_v43 }
  0x89   :  { %451 = vmatprep.subr.bf16.mxu1 %v887_v44  ;;  %695 = vmatpush1.bf16.msra.mxu0 %v923_v5 }
  0x8a   :  { %696 = vmatprep.subr.bf16.mxu0 %v928_v6 }
  0x8c   :  { %452 = vmatpush1.bf16.msra.mxu1 %v889_v45 }
  0x8d   :  { %697 = vmatpush1.bf16.msra.mxu0 %v926_v7 }
  0x8e   :  { %698 = vmatprep.subr.bf16.mxu0 %v931_v8 }
  0x91   :  { %699 = vmatpush1.bf16.msra.mxu0 %v929_v9 }
  0x92   :  { %700 = vmatprep.subr.bf16.mxu0 %v934_v32 }
  0x95   :  { %701 = vmatpush1.bf16.msra.mxu0 %v932_v33 }
  0x96   :  { %702 = vmatprep.subr.bf16.mxu0 %v937_v34 }
  0x99   :  { %703 = vmatpush1.bf16.msra.mxu0 %v935_v35 }
 0x12f   :  { %v193_v19 = vpop.f32.mrb[0].mxu0 }
 0x130   :  { %v194_v21 = vadd.f32 %v193_v19, %v106_v16  ;;  %v195_v22 = vpop.f32.mrb[1].mxu0 }
 0x131   :  { %v196_v23 = vadd.f32 %v195_v22, %v110_v17  ;;  %v197_v24 = vpop.f32.mrb[2].mxu0 }
 0x132   :  { %v211_v25 = vmul.f32 %v204_v18, %v194_v21  ;;  %v198_v26 = vpop.f32.mrb[3].mxu0 }
 0x133   :  { %v212_v27 = vmul.f32 %v208_v20, %v196_v23 }
 0x134   :  { %v213_v28 = vmax.f32 %v194_v21, %v211_v25 }
 0x135   :  { %v214_v29 = vmax.f32 %v196_v23, %v212_v27 }
 0x136   :  { %v215_v31 = vpack.c.bf16 %v213_v28, %v213_v28 }
 0x137   :  { %v216_v30 = vpack.c.bf16 %v214_v29, %v214_v29 }
 0x139   :  { %453 = vmatprep.mubr.bf16.mxu1 %v216_v30 }
 0x13a   :  { %454 = vmatmul.mubr.bf16.vlgmr.msra.gmra.mrb[0].mxu1 %v215_v31 }
 0x20d   :  { %v455_v39 = vpop.f32.mrb[0].mxu1 }
 0x20e   :  { %v456_v40 = vadd.f32 %v455_v39, %v254_v37  ;;  %v457_v41 = vpop.f32.mrb[1].mxu1 }
 0x20f   :  { %v458_v42 = vadd.f32 %v457_v41, %v258_v38  ;;  %v459_v43 = vpop.f32.mrb[2].mxu1 }
 0x210   :  { %v462_v44 = vmul.f32 %v456_v40, %v204_v18  ;;  %v460_v45 = vpop.f32.mrb[3].mxu1 }
 0x211   :  { %v463_v46 = vmul.f32 %v458_v42, %v208_v20 }
 0x212   :  { %v464_v47 = vmax.f32 %v456_v40, %v462_v44 }
 0x213   :  { %v465_v48 = vmax.f32 %v458_v42, %v463_v46 }
 0x214   :  { %v466_v50 = vpack.c.bf16 %v464_v47, %v464_v47 }
 0x215   :  { %v467_v49 = vpack.c.bf16 %v465_v48, %v465_v48 }
 0x217   :  { %704 = vmatprep.mubr.bf16.mxu0 %v467_v49 }
 0x218   :  { %705 = vmatmul.mubr.bf16.vlgmr.msra.gmra.mrb[4].mxu0 %v466_v50 }
 0x2eb   :  { %v706_v55 = vpop.f32.mrb[4].mxu0 }
 0x2ec   :  { %v707_v56 = vadd.f32 %v706_v55, %v505_v52  ;;  %v708_v57 = vpop.f32.mrb[5].mxu0 }
 0x2ed   :  { %v709_v59 = vadd.f32 %v708_v57, %v509_v53  ;;  %v710_v60 = vpop.f32.mrb[6].mxu0 }
 0x2ee   :  { %v713_v62 = vmax.f32 %v707_v56, 0.0  ;;  %v711_v63 = vpop.f32.mrb[7].mxu0 }
 0x2ef   :  { %v714_v0 = vmax.f32 %v709_v59, 0.0 }
 0x2f0   :  { %v727_v1 = vmul.f32 %v720_v58, %v713_v62 }
 0x2f1   :  { %v728_v2 = vmul.f32 %v724_v61, %v714_v0 }
 0x2f3   :  { %v729_v3 = vadd.f32 %v728_v2, %v727_v1 }
 0x2f5   :  { %730 = vadd.xlane.f32.xlu0 %v729_v3 }
 0x382   :  { %v731_v5 = vpop.xlane.xlu0 %730 }
 0x383   :  { %v739_v6 = vadd.f32 %v823_v4, %v731_v5 }
 0x385   :  { %741 = vst.msk [vmem:[%s1182_s10] sm:$0xff] %vm740_vm2, %v739_v6 }
 0x386   :  { %746 = vsyncpa [#allocation4], 1 }
 0x387   :  { %747 = vsyncpa [#allocation6], 1 }
 0x388   :  { %748 = vsyncpa [#allocation9], 1 }

</bundles_post_ra>
